<compile_context>
chip_gen: v5e
topology: v5e:2x2
jax: 0.10.0
libtpu: 0.0.40
codegen_flags: <defaults>
</compile_context>

<pallas_src>
import numpy as np
import jax
import jax.numpy as jnp
from jax.experimental import pallas as pl
from jax.experimental.pallas import tpu as pltpu

_LANE = 128


def _fakeint8_kernel(x_ref, o_ref):
    # x_ref: (TN, C) block of the flattened (H*W, C) input (channels on the lane axis).
    # o_ref: (C, TN) block of the (C, H*W) output (flattened spatial on the lane axis).
    x = x_ref[...].astype(jnp.float32)      # (TN, C)
    xt = x.T                                # (C, TN): single in-VMEM relayout; math + store lane-dense
    # fake-int8 -> float: v >= 0 -> v; v in [-1,0) -> -255v; v <= -1 -> v + 256.
    o_ref[...] = xt + jnp.clip(xt, -1.0, 0.0) * (-256.0)


def _pick_spatial_tile(n: int, c: int) -> int:
    """Block length TN along the flattened H*W axis.

    VMEM accounting (f32, double-buffered):
      input block (TN, C): rows are lane-padded to 128 -> ~512 B per row per buffer.
      output block (C, TN): sublane-padded to >=8 rows -> 4*max(C,8) B per row per buffer.
    Budget ~16 MiB for the pipelined blocks, leaving headroom (within the 32 MiB
    scoped VMEM limit) for the compiler's transpose/cast intermediates.
    """
    budget = 16 * 1024 * 1024
    c_pad = max(8, ((c + 7) // 8) * 8)
    per_row = 2 * (512 + 4 * c_pad)                 # in + out, double-buffered, per spatial row
    cap = max(_LANE, budget // per_row)

    if n % _LANE != 0:
        if n <= cap:
            return n                                 # one full block (full dims satisfy (8,128) rule)
        return min(8192, (cap // _LANE) * _LANE)     # ragged last block, masked on writeback

    limit = min(n, 8192, cap)
    tn = _LANE
    while tn * 2 <= limit and n % (tn * 2) == 0:
        tn *= 2
    # Prefer >= 2 grid steps so both v7x TensorCores get a share (no-op on v5e/v6e).
    if n // tn == 1 and tn >= 2 * _LANE:
        tn //= 2
    return tn


def fakeint8_to_float(x: jax.Array) -> jax.Array:
    """Pallas TPU equivalent of torch_fakeint8_to_float.forward.

    x: (H, W, C) fake-int8 values (any real dtype). Returns (1, C, H, W) float32.
    """
    h, w, c = x.shape
    n = h * w
    x2 = x.reshape(n, c)                    # free row-major view of (H, W, C)
    tn = _pick_spatial_tile(n, c)
    grid = (pl.cdiv(n, tn),)

    out = pl.pallas_call(
        _fakeint8_kernel,
        out_shape=jax.ShapeDtypeStruct((c, n), jnp.float32),
        grid=grid,
        in_specs=[pl.BlockSpec((tn, c), lambda i: (i, 0))],
        out_specs=pl.BlockSpec((c, tn), lambda i: (0, i)),
        compiler_params=pltpu.CompilerParams(
            dimension_semantics=("parallel",),
            vmem_limit_bytes=32 * 1024 * 1024,
        ),
    )(x2)

    return out.reshape(1, c, h, w)          # free row-major view of (C, H*W)


def _reference(x: jax.Array) -> jax.Array:
    """Pure-JAX reference with identical semantics to the torch module."""
    y = jnp.transpose(x, (2, 0, 1)).astype(jnp.float32)
    y = y + jnp.clip(y, -1.0, 0.0) * (-256.0)
    return y[None]


if __name__ == "__main__":
    key = jax.random.PRNGKey(0)
    # fake-int8 input: int8-valued bytes stored in a float tensor, HWC layout.
    x = jax.random.randint(key, (16, 16, 4), -128, 128, dtype=jnp.int32).astype(jnp.float32)

    out = jax.block_until_ready(fakeint8_to_float(x))
    ref = jax.block_until_ready(_reference(x))

    assert out.shape == (1, 4, 16, 16)
    assert out.dtype == jnp.float32
    np.testing.assert_allclose(np.asarray(out), np.asarray(ref), rtol=0, atol=0)

    print("KERNEL_OK")
</pallas_src>

<mosaic_0001>
module attributes {stable_mosaic.version = 11 : i64} {
  func.func @_fakeint8_kernel(%arg0: i32, %arg1: memref<128x4xf32, #tpu.memory_space<vmem>>, %arg2: memref<4x128xf32, #tpu.memory_space<vmem>>) attributes {dimension_semantics = [#tpu.dimension_semantics<parallel>], iteration_bounds = array<i64: 2>, scalar_prefetch = 0 : i64, scratch_operands = 0 : i64, tpu.core_type = #tpu.core_type<tc>, window_params = [{transform_indices = @transform_0, window_bounds = array<i64: 128, 4>}, {transform_indices = @transform_1, window_bounds = array<i64: 4, 128>}]} {
    %c0 = arith.constant 0 : index
    %c0_0 = arith.constant 0 : index
    %0 = vector.load %arg1[%c0, %c0_0] : memref<128x4xf32, #tpu.memory_space<vmem>>, vector<128x4xf32>
    %1 = tpu.transpose %0, [1, 0] : vector<128x4xf32> -> vector<4x128xf32>
    %cst = arith.constant -1.000000e+00 : f32
    %cst_1 = arith.constant 0.000000e+00 : f32
    %2 = vector.broadcast %cst : f32 to vector<4x128xf32>
    %3 = arith.maximumf %2, %1 : vector<4x128xf32>
    %4 = vector.broadcast %cst_1 : f32 to vector<4x128xf32>
    %5 = arith.minimumf %4, %3 : vector<4x128xf32>
    %cst_2 = arith.constant -2.560000e+02 : f32
    %6 = vector.broadcast %cst_2 : f32 to vector<4x128xf32>
    %7 = arith.mulf %5, %6 : vector<4x128xf32>
    %8 = arith.addf %1, %7 : vector<4x128xf32>
    %c0_3 = arith.constant 0 : index
    %c0_4 = arith.constant 0 : index
    %9 = vector.load %arg2[%c0_3, %c0_4] : memref<4x128xf32, #tpu.memory_space<vmem>>, vector<4x128xf32>
    tpu.vector_store %arg2[%c0_3, %c0_4], %8 {strides = array<i32>} : memref<4x128xf32, #tpu.memory_space<vmem>>, vector<4x128xf32>,
    return
  }
  func.func @transform_0(%arg0: i32) -> (i32, i32) {
    %c0_i32 = arith.constant 0 : i32
    %c0_i32_0 = arith.constant 0 : i32
    return %arg0, %c0_i32 : i32, i32
  }
  func.func @transform_1(%arg0: i32) -> (i32, i32) {
    %c0_i32 = arith.constant 0 : i32
    %c0_i32_0 = arith.constant 0 : i32
    return %c0_i32, %arg0 : i32, i32
  }
}

</mosaic_0001>

<bundles_post_ra>
// kernel: tpu_custom_call.1
= control target key start
LH: loop header
LB: loop body
LE: loop exit
PB: predicated region body
PF: predicated region fallthrough
CT: control target
= control target key end

     0   :  { %6 = vsyncpa [#allocation3], 0  ;;  %s471_s0 = inlined_call_operand.vmem [shape: f32[256,4], index: 0, kind: input, shape index: {}]   ;;  %s472_s1 = inlined_call_operand.hbm [shape: f32[4,256], index: 1, kind: output, shape index: {}]  }
   0x1   :  { %8 = vsyncpa [#allocation3 + $0x1], 0  ;;  %s369_s6 = smov 0   ;;  %s371_s7 = smov 0  }
   0x2   :  { %s373_s8 = smov 0   ;;  %s375_s9 = smov 0  }
   0x3 LB: > { %s390_s10 = sadd.s32 4294967295, %s357_s9   ;;  %s245_s11 = sadd.s32 4294967294, %s357_s9   ;;  %s357_s9 = sphi %s375_s9, %s478_s9   ;;  %s353_s8 = sphi %s373_s8, %s477_s8   ;;  %s349_s7 = sphi %s371_s7, %s476_s7   ;;  %s345_s6 = sphi %s369_s6, %s475_s6  }
   0x4   : > { %s394_s12 = sadd.s32 1, %s357_s9   ;;  %s47_s13 = sadd.s32 1, %s353_s8 }
   0x5   : > { %s44_s14 = ssub.s32 %s357_s9, %s394_s12  ;;  %p57_p0 = scmp.ne.s32.totalorder %s353_s8, %s349_s7 }
   0x6   : > { %p45_p1 = scmp.eq.s32.totalorder %s44_s14, 0  ;;  %p58_p2 = scmp.eq.s32.totalorder %s390_s10, 1 }
   0x7   : > { %p63_p3 = scmp.ne.s32.totalorder %s349_s7, %s345_s6  ;;  %p64_p4 = scmp.eq.s32.totalorder %s245_s11, 1 }
   0x8   : > { %s405_s15 = scalar_select %p45_p1, %s353_s8, %s47_s13  }
   0x9   : > { %p407_p5 = por %p58_p2, %p57_p0  ;;  %p411_p6 = por %p64_p4, %p63_p3 }
   0xa   : > { %p248_p7 = scmp.ge.s32.totalorder %s357_s9, 1  ;;  %p91_p8 = scmp.lt.s32.totalorder %s357_s9, 3 }
   0xc   : > { %p92_p9 = pnand %p248_p7, %p91_p8 }
   0xd   : > { %s250_s18 = sshll.u32 (!%p92_p9), %s390_s10, 4  ;;  %s108_s23 = sand.u32 (!%p92_p9), 1, %s349_s7  }
   0xe   : > { %95 = sbr.rel (%p92_p9) target bundleno = 199 (0xc7), region = 24  ;;  %p112_p10 = scmp.lt.s32.totalorder (!%p92_p9), %s250_s18, 31 }
   0xf   : > { %s249_s24 = sshll.u32 (!%p92_p9), %s108_s23, 2  ;;  %s253_s25 = sshll.u32 (!%p92_p9), %s390_s10, 2 }
  0x10   : > { %s181_s28 = scalar_lea.hbm (!%p92_p9), %s472_s1, %s253_s25  ;;  %s110_s29 = scalar_lea.vmem (!%p92_p9), [#allocation2], %s249_s24 }
  0x11   : > { %s183_s30 = sshll.u32 (!%p92_p9), %s110_s29, 4  ;;  %s185_s2 = sshll.u32 (!%p92_p9), %s181_s28, 4  ;;  %s184_s30 = int_to_ptr.vmem [resolvable:$true] %s183_s30  ;;  %s186_s2 = int_to_ptr.hbm [resolvable:$true] %s185_s2 }
  0x12   : > { %s171_s3 = scalar_lea.sflag (!%p92_p9), [#allocation3], %s108_s23  ;;  %s309_s4 = sshra.s32 (!%p92_p9), %s186_s2, 4  ;;  %s310_s4 = int_to_ptr.hbm [resolvable:$true] %s309_s4 }
  0x13   : > { %s480_s18 = smov (!%p112_p10, %s250_s18), 31  ;;  %s311_s5 = scalar_lea.hbm %s310_s4, 4 }
  0x14   : > { %s251_s19 = sshll.u32 %s480_s18, 3  ;;  %p312_p11 = scmp.ne.s32.totalorder %s310_s4, %s311_s5 }
  0x15   : > { %s421_s22 = scalar_lea.vmem %s471_s0, %s251_s19  ;;  %s315_s13 = scalar_lea.hbm %s472_s1, 8 }
  0x16   : > { %v117_v0 = vld [vmem:[%s421_s22] sm:$0xff]  ;;  %v118_v1 = vld [vmem:[%s421_s22 + $0x8] sm:$0xff]  ;;  %v119_v2 = vld [vmem:[%s421_s22 + $0x10] sm:$0xff]  ;;  %p313_p12 = pnand %p312_p11, %p407_p5  ;;  %p316_p0 = scmp.lt.s32.totalorder %s310_s4, %s472_s1 }
  0x17   : > { %133 = vxpose.xlu0.b32.start [1/16] (narrow) %v117_v0, 8  ;;  %v120_v3 = vld [vmem:[%s421_s22 + $0x18] sm:$0xff]  ;;  %v121_v4 = vld [vmem:[%s421_s22 + $0x20] sm:$0xff]  ;;  %v122_v5 = vld [vmem:[%s421_s22 + $0x28] sm:$0xff]  ;;  %p317_p1 = scmp.lt.s32.totalorder %s315_s13, %s311_s5 }
  0x18   : > { %v123_v6 = vld [vmem:[%s421_s22 + $0x30] sm:$0xff]  ;;  %v124_v7 = vld [vmem:[%s421_s22 + $0x38] sm:$0xff]  ;;  %v125_v8 = vld [vmem:[%s421_s22 + $0x40] sm:$0xff]  ;;  %p314_p13 = pneg %p313_p12 }
  0x19   : > { %v126_v9 = vld [vmem:[%s421_s22 + $0x48] sm:$0xff]  ;;  %v127_v10 = vld [vmem:[%s421_s22 + $0x50] sm:$0xff]  ;;  %v128_v11 = vld [vmem:[%s421_s22 + $0x58] sm:$0xff]  ;;  %p318_p2 = por %p317_p1, %p316_p0 }
  0x1a   : > { %v129_v12 = vld [vmem:[%s421_s22 + $0x60] sm:$0xff]  ;;  %v130_v13 = vld [vmem:[%s421_s22 + $0x68] sm:$0xff]  ;;  %v131_v14 = vld [vmem:[%s421_s22 + $0x70] sm:$0xff] }
  0x1b   : > { %v132_v15 = vld [vmem:[%s421_s22 + $0x78] sm:$0xff]  ;;  %p319_p3 = pnand %p318_p2, %p314_p13 }
  0x1f   : > { %134 = vxpose.xlu0.b32.cont [2/16] (narrow) %v118_v1, 8 }
  0x27   : > { %135 = vxpose.xlu0.b32.cont [3/16] (narrow) %v119_v2, 8 }
  0x2f   : > { %136 = vxpose.xlu0.b32.cont [4/16] (narrow) %v120_v3, 8 }
  0x37   : > { %137 = vxpose.xlu0.b32.cont [5/16] (narrow) %v121_v4, 8 }
  0x3f   : > { %138 = vxpose.xlu0.b32.cont [6/16] (narrow) %v122_v5, 8 }
  0x47   : > { %139 = vxpose.xlu0.b32.cont [7/16] (narrow) %v123_v6, 8 }
  0x4f   : > { %140 = vxpose.xlu0.b32.cont [8/16] (narrow) %v124_v7, 8 }
  0x57   : > { %141 = vxpose.xlu0.b32.cont [9/16] (narrow) %v125_v8, 8 }
  0x5f   : > { %142 = vxpose.xlu0.b32.cont [10/16] (narrow) %v126_v9, 8 }
  0x67   : > { %143 = vxpose.xlu0.b32.cont [11/16] (narrow) %v127_v10, 8 }
  0x6f   : > { %144 = vxpose.xlu0.b32.cont [12/16] (narrow) %v128_v11, 8 }
  0x77   : > { %145 = vxpose.xlu0.b32.cont [13/16] (narrow) %v129_v12, 8 }
  0x7f   : > { %146 = vxpose.xlu0.b32.cont [14/16] (narrow) %v130_v13, 8 }
  0x87   : > { %147 = vxpose.xlu0.b32.cont [15/16] (narrow) %v131_v14, 8 }
  0x8f   : > { %148 = vxpose.xlu0.b32.end [16/16] (narrow) %v132_v15, 8 }
  0xbb   : > { %v149_v16 = vpop.trf.xlu0 }
  0xbc   : > { %v165_v17 = vmax.f32 %v149_v16, -1.0 }
  0xbe   : > { %v166_v18 = vmin.f32 %v165_v17, 0.0 }
  0xc0   : > { %v167_v19 = vmul.f32 -256.0, %v166_v18 }
  0xc2   : > { %v168_v20 = vadd.f32 %v167_v19, %v149_v16 }
  0xc4   : > { %169 = vst [vmem:[%s110_s29] sm:$0xf] %v168_v20 }
  0xc5   : > { %322 = shalt.err (!%p319_p3)
}
  0xc6   : > { %256 = dma.vmem_to_hbm [thread:$0]  (%p407_p5), %s184_s30, 64, %s186_s2, %s171_s3  }
  0xc7 PF: > { %p262_p4 = scmp.ge.s32.totalorder %s357_s9, 2  ;;  %s197_s19 = sand.u32 1, %s345_s6  }
  0xc8   : > { %s198_s20 = scalar_lea.sflag [#allocation3], %s197_s19 }
  0xc9   : > { %p259_p7 = pnand %p262_p4, %p411_p6 }
  0xcb   : > { %p260_p8 = pneg %p259_p7 }
  0xcd   : > { %340 = dma.done.wait (%p260_p8), %s198_s20, 64  }
  0xce   : > { %342 = vsyncadd (%p260_p8), %s198_s20, 4294967232  ;;  %p11_p9 = scmp.ge.s32.totalorder %s394_s12, 4   ;;  %s475_s6 = smov %s349_s7 }
  0xcf   : > { %s476_s7 = smov %s353_s8  ;;  %s477_s8 = smov %s405_s15 }
  0xd0   : > { %s478_s9 = smov %s394_s12  ;;  %13 = sbr.rel (!%p11_p9) target bundleno = 3 (0x3), region = 59 }
  0xd5   :  { %204 = vsyncpa [#allocation3], 1 }
  0xd6   :  { %206 = vsyncpa [#allocation3 + $0x1], 1 }

</bundles_post_ra>
